<compile_context>
chip_gen: v5e
topology: v5e:2x2
jax: 0.10.0
libtpu: 0.0.40
codegen_flags: <defaults>
</compile_context>

<pallas_src>
import jax
import jax.numpy as jnp
from jax import lax
from jax.experimental import pallas as pl
from jax.experimental.pallas import tpu as pltpu


_MiB = 1024 * 1024
_GATE_PERM = (0, 1, 3, 2)   # PyTorch (i, f, g, o)  ->  kernel order (i, f, o, g)


# ----------------------------------------------------------------------------- helpers
def _round_up(x, m):
    return ((x + m - 1) // m) * m


def _vmem_budget_bytes():
    """Generation-aware usable VMEM budget (leaves headroom for Mosaic)."""
    cap = None
    try:
        info = pltpu.get_tpu_info()
        cap = getattr(info, "vmem_capacity_bytes", None)
    except Exception:
        cap = None
    if not cap:
        cap = 64 * _MiB          # conservative fallback (v7x per-TC size)
    budget = max(int(cap) - 28 * _MiB, int(cap) // 2)
    return int(min(budget, 100 * _MiB))


# --- capability probe: single-buffering of constant-index blocks (pl.Buffered(1)) -------
def _probe_copy_kernel(x_ref, o_ref):
    o_ref[...] = x_ref[...]


def _probe_buffered_one():
    try:
        x = jnp.arange(8 * 128, dtype=jnp.float32).reshape(8, 128)
        fn = pl.pallas_call(
            _probe_copy_kernel,
            out_shape=jax.ShapeDtypeStruct((8, 128), jnp.float32),
            grid_spec=pltpu.PrefetchScalarGridSpec(
                num_scalar_prefetch=0,
                grid=(1,),
                in_specs=[pl.BlockSpec((8, 128), lambda i: (0, 0),
                                       pipeline_mode=pl.Buffered(1))],
                out_specs=pl.BlockSpec((8, 128), lambda i: (0, 0)),
            ),
        )
        out = jax.block_until_ready(fn(x))
        return bool(jnp.allclose(out, x))
    except Exception:
        return False


_BUFFERED_ONE = None


def _buffered_one():
    global _BUFFERED_ONE
    if _BUFFERED_ONE is None:
        _BUFFERED_ONE = _probe_buffered_one()
    return _BUFFERED_ONE


def _const_spec(block_shape, index_map):
    """BlockSpec for a block whose index never changes: single-buffered when supported."""
    if _buffered_one():
        return pl.BlockSpec(block_shape, index_map, pipeline_mode=pl.Buffered(1))
    return pl.BlockSpec(block_shape, index_map)


# ----------------------------------------------------------------------- weight reshaping
def _gate_pad_T(w, H, Hp):
    """(4H, K) gate-stacked weight (PyTorch order i,f,g,o) -> transposed (K, 4*Hp) with
    gate columns reordered to (i,f,o,g) and each gate zero-padded to Hp (exact)."""
    K = w.shape[1]
    w4 = w.reshape(4, H, K)[jnp.array(_GATE_PERM)]             # (4, H, K) reordered
    w4 = jnp.pad(w4, ((0, 0), (0, Hp - H), (0, 0)))            # (4, Hp, K)
    return jnp.transpose(w4, (2, 0, 1)).reshape(K, 4 * Hp)     # (K, 4*Hp)


# ------------------------------------------------------------------- batched matmul + bias
def _matmul_bias_kernel(x_ref, w_ref, b_ref, o_ref):
    acc = jnp.dot(x_ref[...], w_ref[...], preferred_element_type=jnp.float32)
    o_ref[...] = (acc + b_ref[...]).astype(o_ref.dtype)


def _matmul_bias(x, w, b, out_dtype, vmem_budget):
    """Row-tiled (rows, K) @ (K, N) + (1, N).  R is VMEM-budget driven; rows are padded to
    a multiple of R (padding sliced off), so the footprint is always bounded."""
    rows, K = x.shape
    N = w.shape[1]
    xb = jnp.dtype(x.dtype).itemsize
    ob = jnp.dtype(out_dtype).itemsize
    wb = jnp.dtype(w.dtype).itemsize
    w_bufs = 1 if _buffered_one() else 2
    resident = K * N * wb * w_bufs + N * 4 * w_bufs            # weight + bias blocks
    avail = max(int(vmem_budget * 0.8) - resident, 1 * _MiB)
    per_row = 2 * (K * xb + N * ob)                            # double-buffered in + out
    R = max(8, min(1024, (avail // per_row) // 8 * 8))
    R = min(R, _round_up(rows, 8))
    Rp = _round_up(rows, R)
    xp = x if Rp == rows else jnp.pad(x, ((0, Rp - rows), (0, 0)))

    out = pl.pallas_call(
        _matmul_bias_kernel,
        out_shape=jax.ShapeDtypeStruct((Rp, N), out_dtype),
        grid_spec=pltpu.PrefetchScalarGridSpec(
            num_scalar_prefetch=0,
            grid=(Rp // R,),
            in_specs=[
                pl.BlockSpec((R, K), lambda i: (i, 0)),
                _const_spec((K, N), lambda i: (0, 0)),
                _const_spec((1, N), lambda i: (0, 0)),
            ],
            out_specs=pl.BlockSpec((R, N), lambda i: (i, 0)),
        ),
        compiler_params=pltpu.CompilerParams(
            dimension_semantics=("parallel",),
            vmem_limit_bytes=vmem_budget,
        ),
    )(xp, w, b)
    return out if Rp == rows else out[:rows]


# ----------------------------------------------------------------------- recurrent kernel
def _pick_time_chunk(T, B, Hp, elem_bytes, vmem_budget, buffered_one, cap):
    """Budget-driven time-chunk size; minimizes padding for the chosen chunk count."""
    w_bufs = 1 if buffered_one else 2
    fixed = (Hp * 4 * Hp * elem_bytes) * w_bufs                # resident W_hh^T
    fixed += (2 * w_bufs + 2 * 2) * B * Hp * 4                 # h0/c0 in + hn/cn out
    fixed += 2 * B * Hp * 4                                    # h/c scratch
    per_t = 2 * B * (4 * Hp * elem_bytes + Hp * elem_bytes)    # gx chunk + hs chunk (x2 buf)
    avail = int(vmem_budget * 0.8) - fixed
    tc_max = max(1, min(cap, avail // per_t))
    tc_max = min(tc_max, T)
    nchunks = -(-T // tc_max)
    tc = -(-T // nchunks)
    tp = nchunks * tc
    return tc, tp


def _make_lstm_kernel(Hp, Tc, T_total, Tp, unroll):
    needs_mask = Tp != T_total   # padded time steps must not disturb the carried state

    def kernel(gx_ref, w_hh_ref, h0_ref, c0_ref, hs_ref, hn_ref, cn_ref, h_scr, c_scr):
        # Initialize recurrent state from (h0, c0) on the first time chunk.
        @pl.when(pl.program_id(0) == 0)
        def _():
            h_scr[...] = h0_ref[...]
            c_scr[...] = c0_ref[...]

        # Resident weight: loaded once per chunk, reused across all Tc serial steps.
        w_hh = w_hh_ref[...]                       # (Hp, 4*Hp)
        base_t = pl.program_id(0) * Tc

        def step(t, carry):
            h_prev = h_scr[...]                    # (B, Hp) f32
            c_prev = c_scr[...]
            # x-projection and bias were precomputed (stored in compute dtype); cast back
            # to f32 at the add site so gate math accumulates in f32.
            gates = gx_ref[t].astype(jnp.float32) + jnp.dot(
                h_prev.astype(w_hh.dtype), w_hh, preferred_element_type=jnp.float32)
            # Gate order (i, f, o, g): one wide sigmoid, one tanh; slices are
            # lane-group aligned (Hp % 128 == 0).
            sig = jax.nn.sigmoid(gates[:, : 3 * Hp])
            i_g = sig[:, 0 * Hp:1 * Hp]
            f_g = sig[:, 1 * Hp:2 * Hp]
            o_g = sig[:, 2 * Hp:3 * Hp]
            g_g = jnp.tanh(gates[:, 3 * Hp:])
            c_new = f_g * c_prev + i_g * g_g
            h_new = o_g * jnp.tanh(c_new)
            if needs_mask:
                # Freeze the state on padded time steps (t_global >= T_total).
                keep = ((base_t + t) < T_total).astype(jnp.float32)
                c_new = keep * c_new + (1.0 - keep) * c_prev
                h_new = keep * h_new + (1.0 - keep) * h_prev
            c_scr[...] = c_new
            h_scr[...] = h_new
            hs_ref[t] = h_new.astype(hs_ref.dtype)   # (Tc, B, Hp) slab; padded rows unused
            return carry

        lax.fori_loop(0, Tc, step, 0, unroll=unroll)

        # Emit current state every chunk (tiny) so the resident outputs are always valid;
        # the value after the last chunk is the final (h_n, c_n).
        hn_ref[...] = h_scr[...]
        cn_ref[...] = c_scr[...]

    return kernel


# --------------------------------------------------------------------------- full forward
def lstm_forward(X, hidden, params, compute_dtype=jnp.bfloat16, max_time_chunk=None):
    """X: (B, T, V) batch-first, hidden = (h0, c0) each (1, B, H).
    Returns (out2, (h_n, c_n)) matching the PyTorch module semantics."""
    h0, c0 = hidden
    B, T, V = X.shape
    H = params["w_hh"].shape[1]          # w_hh: (4H, H)
    Hp = _round_up(H, 128)               # lane-aligned hidden width
    Vp = _round_up(V, 128)               # lane-aligned head output width
    f32 = jnp.float32
    cbytes = jnp.dtype(compute_dtype).itemsize
    vmem_budget = _vmem_budget_bytes()
    buffered_one = _buffered_one()

    # ---- weight prep (small, per-gate zero padding + (i,f,o,g) reorder; exact) ----
    w_ih_t = _gate_pad_T(params["w_ih"], H, Hp).astype(compute_dtype)            # (V, 4Hp)
    w_hh_t = jnp.pad(_gate_pad_T(params["w_hh"], H, Hp),
                     ((0, Hp - H), (0, 0))).astype(compute_dtype)                # (Hp, 4Hp)
    b = jnp.pad((params["b_ih"] + params["b_hh"]).reshape(4, H)[jnp.array(_GATE_PERM)],
                ((0, 0), (0, Hp - H))).reshape(1, 4 * Hp).astype(f32)
    w_lin_t = jnp.pad(params["w_lin"].T,
                      ((0, Hp - H), (0, Vp - V))).astype(compute_dtype)          # (Hp, Vp)
    b_lin = jnp.pad(params["b_lin"], (0, Vp - V)).reshape(1, Vp).astype(f32)

    h0_p = jnp.pad(h0[0], ((0, 0), (0, Hp - H))).astype(f32)                     # (B, Hp)
    c0_p = jnp.pad(c0[0], ((0, 0), (0, Hp - H))).astype(f32)

    # ---- 1) hoisted input projection, time-major row order t*B + b ----
    # gates_x stored in compute_dtype (bf16 in production) to halve its HBM round trip.
    # TODO(synk): keep a single batch-major layout end-to-end to drop this transpose.
    x2 = jnp.transpose(X, (1, 0, 2)).reshape(T * B, V).astype(compute_dtype)
    gates_x = _matmul_bias(x2, w_ih_t, b, compute_dtype,
                           vmem_budget).reshape(T, B, 4 * Hp)

    # ---- 2) recurrent kernel: Tc time steps per grid step (budget-driven, T padded) ----
    Tc, Tp = _pick_time_chunk(T, B, Hp, cbytes, vmem_budget, buffered_one,
                              cap=(max_time_chunk or 64))
    if Tp != T:
        gates_x = jnp.pad(gates_x, ((0, Tp - T), (0, 0), (0, 0)))
    unroll = max(1, min(Tc, 8))
    kernel = _make_lstm_kernel(Hp, Tc, T, Tp, unroll)

    hs, h_n, c_n = pl.pallas_call(
        kernel,
        out_shape=(
            jax.ShapeDtypeStruct((Tp, B, Hp), compute_dtype),   # h_t slab for the head
            jax.ShapeDtypeStruct((B, Hp), f32),                 # h_n
            jax.ShapeDtypeStruct((B, Hp), f32),                 # c_n
        ),
        grid_spec=pltpu.PrefetchScalarGridSpec(
            num_scalar_prefetch=0,
            grid=(Tp // Tc,),
            in_specs=[
                pl.BlockSpec((Tc, B, 4 * Hp), lambda i: (i, 0, 0)),   # gates_x chunk
                _const_spec((Hp, 4 * Hp), lambda i: (0, 0)),          # W_hh^T (resident)
                _const_spec((B, Hp), lambda i: (0, 0)),               # h0
                _const_spec((B, Hp), lambda i: (0, 0)),               # c0
            ],
            out_specs=[
                pl.BlockSpec((Tc, B, Hp), lambda i: (i, 0, 0)),       # h_t chunk
                pl.BlockSpec((B, Hp), lambda i: (0, 0)),              # h_n (resident)
                pl.BlockSpec((B, Hp), lambda i: (0, 0)),              # c_n (resident)
            ],
            scratch_shapes=[
                pltpu.VMEM((B, Hp), f32),   # h state
                pltpu.VMEM((B, Hp), f32),   # c state
            ],
        ),
        compiler_params=pltpu.CompilerParams(
            dimension_semantics=("arbitrary",),   # sequential recurrence over time
            vmem_limit_bytes=vmem_budget,
        ),
    )(gates_x, w_hh_t, h0_p, c0_p)

    # ---- 3) hoisted linear head over all T*B rows ----
    hs_valid = hs[:T] if Tp != T else hs
    out_p = _matmul_bias(hs_valid.reshape(T * B, Hp), w_lin_t, b_lin, f32,
                         vmem_budget)                                    # (T*B, Vp)

    # (T*B, Vp) -> (B*T, V), row index = b*T + t (matches out1.contiguous().view(-1, H)).
    out2 = jnp.transpose(out_p[:, :V].reshape(T, B, V), (1, 0, 2)).reshape(B * T, V)
    return out2, (h_n[:, :H][None], c_n[:, :H][None])


# ---------------------------------------------------------------------------- reference
def _reference_forward(X, hidden, params):
    """Pure-JAX f32 reference (lax.scan) of the same forward, for validation."""
    h0, c0 = hidden
    B, T, V = X.shape
    H = params["w_hh"].shape[1]
    w_ih_t, w_hh_t = params["w_ih"].T, params["w_hh"].T
    b = params["b_ih"] + params["b_hh"]

    def step(carry, x_t):
        h, c = carry
        g = x_t @ w_ih_t + h @ w_hh_t + b
        i = jax.nn.sigmoid(g[:, 0 * H:1 * H])
        f = jax.nn.sigmoid(g[:, 1 * H:2 * H])
        gg = jnp.tanh(g[:, 2 * H:3 * H])
        o = jax.nn.sigmoid(g[:, 3 * H:4 * H])
        c = f * c + i * gg
        h = o * jnp.tanh(c)
        return (h, c), h

    (h_n, c_n), hs = lax.scan(step, (h0[0], c0[0]), jnp.transpose(X, (1, 0, 2)))
    out1 = jnp.transpose(hs, (1, 0, 2)).reshape(B * T, H)
    out2 = out1 @ params["w_lin"].T + params["b_lin"]
    return out2, (h_n[None], c_n[None])


if __name__ == "__main__":
    B, T, V, H = 2, 8, 16, 32
    key = jax.random.PRNGKey(0)
    ks = jax.random.split(key, 10)
    bound = 1.0 / jnp.sqrt(H)

    params = {
        "w_ih":  jax.random.uniform(ks[0], (4 * H, V), jnp.float32, -bound, bound),
        "w_hh":  jax.random.uniform(ks[1], (4 * H, H), jnp.float32, -bound, bound),
        "b_ih":  jax.random.uniform(ks[2], (4 * H,),   jnp.float32, -bound, bound),
        "b_hh":  jax.random.uniform(ks[3], (4 * H,),   jnp.float32, -bound, bound),
        "w_lin": jax.random.uniform(ks[4], (V, H),     jnp.float32, -bound, bound),
        "b_lin": jax.random.uniform(ks[5], (V,),       jnp.float32, -bound, bound),
    }

    X = jax.random.normal(ks[6], (B, T, V), jnp.float32)
    h0 = jax.random.normal(ks[7], (1, B, H), jnp.float32) * 0.1
    c0 = jnp.zeros((1, B, H), jnp.float32)

    ref_out2, (ref_hn, ref_cn) = _reference_forward(X, (h0, c0), params)

    # f32 matmul path (precision check against the reference; validation only).
    out_f, (hn_f, cn_f) = lstm_forward(X, (h0, c0), params, compute_dtype=jnp.float32)
    # bf16 matmul path (production configuration).
    out_b, (hn_b, cn_b) = lstm_forward(X, (h0, c0), params, compute_dtype=jnp.bfloat16)
    jax.block_until_ready((out_f, hn_f, cn_f, out_b, hn_b, cn_b))

    assert out_f.shape == (B * T, V) and out_b.shape == (B * T, V)
    assert hn_f.shape == (1, B, H) and cn_f.shape == (1, B, H)
    assert hn_b.shape == (1, B, H) and cn_b.shape == (1, B, H)

    assert jnp.allclose(out_f, ref_out2, atol=1e-3, rtol=1e-3)
    assert jnp.allclose(hn_f, ref_hn, atol=1e-3, rtol=1e-3)
    assert jnp.allclose(cn_f, ref_cn, atol=1e-3, rtol=1e-3)

    assert jnp.allclose(out_b, ref_out2, atol=5e-2, rtol=5e-2)
    assert jnp.allclose(hn_b, ref_hn, atol=5e-2, rtol=5e-2)
    assert jnp.allclose(cn_b, ref_cn, atol=5e-2, rtol=5e-2)

    # Multi-chunk + time-padding path: T=13 with a forced small time chunk (Tc=4 -> Tp=16)
    # exercises the masked padded steps and the cross-chunk state carry.
    T2 = 13
    X2 = jax.random.normal(ks[8], (B, T2, V), jnp.float32)
    h02 = jax.random.normal(ks[9], (1, B, H), jnp.float32) * 0.1
    c02 = jnp.zeros((1, B, H), jnp.float32)
    ref_out2p, (ref_hn2, ref_cn2) = _reference_forward(X2, (h02, c02), params)
    out_p2, (hn_p2, cn_p2) = lstm_forward(X2, (h02, c02), params,
                                          compute_dtype=jnp.float32, max_time_chunk=4)
    jax.block_until_ready((out_p2, hn_p2, cn_p2))
    assert out_p2.shape == (B * T2, V)
    assert jnp.allclose(out_p2, ref_out2p, atol=1e-3, rtol=1e-3)
    assert jnp.allclose(hn_p2, ref_hn2, atol=1e-3, rtol=1e-3)
    assert jnp.allclose(cn_p2, ref_cn2, atol=1e-3, rtol=1e-3)

    print("KERNEL_OK")
</pallas_src>

<mosaic_0001>
module attributes {stable_mosaic.version = 11 : i64} {
  func.func @_probe_copy_kernel(%arg0: i32, %arg1: memref<8x128xf32, #tpu.memory_space<vmem>>, %arg2: memref<8x128xf32, #tpu.memory_space<vmem>>) attributes {dimension_semantics = [#tpu.dimension_semantics<arbitrary>], iteration_bounds = array<i64: 1>, scalar_prefetch = 0 : i64, scratch_operands = 0 : i64, tpu.core_type = #tpu.core_type<tc>, window_params = [{pipeline_mode = #tpu.pipeline_mode<synchronous>, transform_indices = @transform_0, window_bounds = array<i64: 8, 128>}, {pipeline_mode = #tpu.pipeline_mode<synchronous>, transform_indices = @transform_1, window_bounds = array<i64: 8, 128>}]} {
    %c0 = arith.constant 0 : index
    %c0_0 = arith.constant 0 : index
    %0 = vector.load %arg1[%c0, %c0_0] : memref<8x128xf32, #tpu.memory_space<vmem>>, vector<8x128xf32>
    %c0_1 = arith.constant 0 : index
    %c0_2 = arith.constant 0 : index
    %1 = vector.load %arg2[%c0_1, %c0_2] : memref<8x128xf32, #tpu.memory_space<vmem>>, vector<8x128xf32>
    tpu.vector_store %arg2[%c0_1, %c0_2], %0 {strides = array<i32>} : memref<8x128xf32, #tpu.memory_space<vmem>>, vector<8x128xf32>,
    return
  }
  func.func @transform_0(%arg0: i32) -> (i32, i32) {
    %c0_i32 = arith.constant 0 : i32
    %c0_i32_0 = arith.constant 0 : i32
    %c0_i32_1 = arith.constant 0 : i32
    return %c0_i32, %c0_i32_0 : i32, i32
  }
  func.func @transform_1(%arg0: i32) -> (i32, i32) {
    %c0_i32 = arith.constant 0 : i32
    %c0_i32_0 = arith.constant 0 : i32
    %c0_i32_1 = arith.constant 0 : i32
    return %c0_i32, %c0_i32_0 : i32, i32
  }
}

module attributes {stable_mosaic.version = 11 : i64} {
  func.func @_matmul_bias_kernel(%arg0: i32, %arg1: memref<16x16xf32, #tpu.memory_space<vmem>>, %arg2: memref<16x512xf32, #tpu.memory_space<vmem>>, %arg3: memref<1x512xf32, #tpu.memory_space<vmem>>, %arg4: memref<16x512xf32, #tpu.memory_space<vmem>>) attributes {dimension_semantics = [#tpu.dimension_semantics<parallel>], iteration_bounds = array<i64: 1>, scalar_prefetch = 0 : i64, scratch_operands = 0 : i64, tpu.core_type = #tpu.core_type<tc>, window_params = [{transform_indices = @transform_0, window_bounds = array<i64: 16, 16>}, {pipeline_mode = #tpu.pipeline_mode<synchronous>, transform_indices = @transform_1, window_bounds = array<i64: 16, 512>}, {pipeline_mode = #tpu.pipeline_mode<synchronous>, transform_indices = @transform_2, window_bounds = array<i64: 1, 512>}, {transform_indices = @transform_3, window_bounds = array<i64: 16, 512>}]} {
    %c0 = arith.constant 0 : index
    %c0_0 = arith.constant 0 : index
    %0 = vector.load %arg1[%c0, %c0_0] : memref<16x16xf32, #tpu.memory_space<vmem>>, vector<16x16xf32>
    %c0_1 = arith.constant 0 : index
    %c0_2 = arith.constant 0 : index
    %1 = vector.load %arg2[%c0_1, %c0_2] : memref<16x512xf32, #tpu.memory_space<vmem>>, vector<16x512xf32>
    %cst = arith.constant dense<0.000000e+00> : vector<16x512xf32>
    %2 = tpu.matmul %0, %1, %cst {dimension_numbers = #tpu.dot_dimension_numbers<[1], [0], [0], [1], [0, 0, 1, 1], [], []>} : vector<16x16xf32>, vector<16x512xf32>, vector<16x512xf32> -> vector<16x512xf32>
    %c0_3 = arith.constant 0 : index
    %c0_4 = arith.constant 0 : index
    %3 = vector.load %arg3[%c0_3, %c0_4] : memref<1x512xf32, #tpu.memory_space<vmem>>, vector<1x512xf32>
    %4 = vector.broadcast %3 : vector<1x512xf32> to vector<16x512xf32>
    %5 = arith.addf %2, %4 : vector<16x512xf32>
    %c0_5 = arith.constant 0 : index
    %c0_6 = arith.constant 0 : index
    %6 = vector.load %arg4[%c0_5, %c0_6] : memref<16x512xf32, #tpu.memory_space<vmem>>, vector<16x512xf32>
    tpu.vector_store %arg4[%c0_5, %c0_6], %5 {strides = array<i32>} : memref<16x512xf32, #tpu.memory_space<vmem>>, vector<16x512xf32>,
    return
  }
  func.func @transform_0(%arg0: i32) -> (i32, i32) {
    %c0_i32 = arith.constant 0 : i32
    %c0_i32_0 = arith.constant 0 : i32
    return %arg0, %c0_i32 : i32, i32
  }
  func.func @transform_1(%arg0: i32) -> (i32, i32) {
    %c0_i32 = arith.constant 0 : i32
    %c0_i32_0 = arith.constant 0 : i32
    %c0_i32_1 = arith.constant 0 : i32
    return %c0_i32, %c0_i32_0 : i32, i32
  }
  func.func @transform_2(%arg0: i32) -> (i32, i32) {
    %c0_i32 = arith.constant 0 : i32
    %c0_i32_0 = arith.constant 0 : i32
    %c0_i32_1 = arith.constant 0 : i32
    return %c0_i32, %c0_i32_0 : i32, i32
  }
  func.func @transform_3(%arg0: i32) -> (i32, i32) {
    %c0_i32 = arith.constant 0 : i32
    %c0_i32_0 = arith.constant 0 : i32
    return %arg0, %c0_i32 : i32, i32
  }
}

</mosaic_0001>

<bundles_post_ra>
// kernel: tpu_custom_call.1
= control target key start
LH: loop header
LB: loop body
LE: loop exit
PB: predicated region body
PF: predicated region fallthrough
CT: control target
= control target key end

     0   :  { %6 = vsyncpa [#allocation3], 0  ;;  %s114_s0 = inlined_call_operand.hbm [shape: f32[8,128], index: 0, kind: input, shape index: {}]   ;;  %s115_s1 = inlined_call_operand.hbm [shape: f32[8,128], index: 1, kind: output, shape index: {}]  }
   0x1   :  { %7 = vsyncpa [#allocation4], 0  ;;  %s13_s8 = sshll.u32 %s114_s0, 4  ;;  %s96_s9 = smov [#allocation2]   ;;  %s14_s8 = int_to_ptr.hbm [resolvable:$true] %s13_s8 }
   0x2   :  { %s15_s10 = sshll.u32 %s96_s9, 4  ;;  %s16_s10 = int_to_ptr.vmem [resolvable:$true] %s15_s10 }
   0x3   :  { %18 = dma.hbm_to_vmem [thread:$0]  %s14_s8, 128, %s16_s10, [#allocation3]  }
   0x4   :  { %92 = dma.done.wait [#allocation3], 128  }
   0x5   :  { %93 = vsyncadd [#allocation3], 4294967168  ;;  %s97_s11 = smov [#allocation5]   ;;  %s32_s15 = sshll.u32 %s115_s1, 4  ;;  %v23_v0 = vld [vmem:[#allocation2] sm:$0xff]  ;;  %s33_s15 = int_to_ptr.hbm [resolvable:$true] %s32_s15 }
   0x6   :  { %s30_s12 = sshll.u32 %s97_s11, 4  ;;  %24 = vst [vmem:[#allocation5] sm:$0xff] %v23_v0  ;;  %s31_s12 = int_to_ptr.vmem [resolvable:$true] %s30_s12 }
   0x7   :  { %35 = dma.vmem_to_hbm [thread:$0]  %s31_s12, 128, %s33_s15, [#allocation4]  }
   0x8   :  { %94 = dma.done.wait [#allocation4], 128  }
   0x9   :  { %95 = vsyncadd [#allocation4], 4294967168 }
   0xa   :  { %40 = vsyncpa [#allocation3], 1 }
   0xb   :  { %41 = vsyncpa [#allocation4], 1 }

// kernel: tpu_custom_call.1
= control target key start
LH: loop header
LB: loop body
LE: loop exit
PB: predicated region body
PF: predicated region fallthrough
CT: control target
= control target key end

     0   :  { %8 = vsyncpa [#allocation3], 0  ;;  %s379_s0 = inlined_call_operand.hbm [shape: f32[16,16], index: 0, kind: input, shape index: {}]   ;;  %s380_s1 = inlined_call_operand.hbm [shape: f32[16,512], index: 1, kind: input, shape index: {}]   ;;  %s381_s2 = inlined_call_operand.hbm [shape: f32[1,512], index: 2, kind: input, shape index: {}]   ;;  %s382_s3 = inlined_call_operand.hbm [shape: f32[16,512], index: 3, kind: output, shape index: {}]  }
   0x1   :  { %9 = vsyncpa [#allocation6], 0  ;;  %s28_s14 = sshll.u32 %s380_s1, 4  ;;  %s29_s14 = int_to_ptr.hbm [resolvable:$true] %s28_s14 }
   0x2   :  { %10 = vsyncpa [#allocation4], 0  ;;  %s325_s15 = smov [#allocation5]   ;;  %s15_s19 = sshll.u32 %s379_s0, 4  ;;  %s16_s19 = int_to_ptr.hbm [resolvable:$true] %s15_s19 }
   0x3   :  { %s30_s16 = sshll.u32 %s325_s15, 4  ;;  %s326_s20 = smov 512   ;;  %s31_s16 = int_to_ptr.vmem [resolvable:$true] %s30_s16 }
   0x4   :  { %s327_s21 = smov 32   ;;  %s328_s22 = smov [#allocation2]  }
   0x5   :  { %36 = dma.hbm_to_vmem [thread:$0]  %s29_s14, 1024, %s31_s16, [#allocation6], %s326_s20, %s326_s20, %s327_s21  }
   0x6   :  { %s17_s23 = sshll.u32 %s328_s22, 4  ;;  %s329_s1 = smov 128   ;;  %s18_s23 = int_to_ptr.vmem [resolvable:$true] %s17_s23 }
   0x7   :  { %s330_s24 = smov 8   ;;  %s42_s27 = sshll.u32 %s381_s2, 4  ;;  %s43_s27 = int_to_ptr.hbm [resolvable:$true] %s42_s27 }
   0x8   :  { %23 = dma.hbm_to_vmem [thread:$0]  %s16_s19, 256, %s18_s23, [#allocation3], %s329_s1, %s329_s1, %s330_s24  }
   0x9   :  { %s331_s28 = smov [#allocation7]  }
   0xa   :  { %s44_s0 = sshll.u32 %s331_s28, 4  ;;  %s45_s0 = int_to_ptr.vmem [resolvable:$true] %s44_s0 }
   0xb   :  { %47 = dma.hbm_to_vmem [thread:$0]  %s43_s27, 64, %s45_s0, [#allocation6]  }
   0xc   :  { %319 = dma.done.wait [#allocation3], 256  }
   0xd   :  { %320 = vsyncadd [#allocation3], 4294967040 }
   0xe   :  { %321 = dma.done.wait [#allocation6], 1088  }
   0xf   :  { %322 = vsyncadd [#allocation6], 4294966208  ;;  %v68_v0 = vld [vmem:[#allocation5 + $0x30] sm:$0xff]  ;;  %v69_v1 = vld [vmem:[#allocation5 + $0x38] sm:$0xff]  ;;  %vm80_vm0 = vcmask 130048   ;;  %s332_s2 = smov [#allocation8]  }
  0x10   :  { %v64_v2 = vld [vmem:[#allocation5 + $0x10] sm:$0xff]  ;;  %147 = vmatpush.msra.mxu2 %v68_v0  ;;  %170 = vmatpush.msra.mxu3 %v69_v1  ;;  %v65_v3 = vld [vmem:[#allocation5 + $0x18] sm:$0xff]  ;;  %v66_v5 = vld [vmem:[#allocation5 + $0x20] sm:$0xff]  ;;  %s191_s29 = sshll.u32 %s332_s2, 4  ;;  %s193_s5 = sshll.u32 %s382_s3, 4  ;;  %s192_s29 = int_to_ptr.vmem [resolvable:$true] %s191_s29  ;;  %s194_s5 = int_to_ptr.hbm [resolvable:$true] %s193_s5 }
  0x11   :  { %v60_v4 = vld [vmem:[#allocation2] sm:$0xff]  ;;  %101 = vmatpush.msra.mxu0 %v66_v5  ;;  %v67_v6 = vld [vmem:[#allocation5 + $0x28] sm:$0xff]  ;;  %v62_v7 = vld [vmem:[#allocation5] sm:$0xff] }
  0x12   :  { %148 = vmatpush.msra.mxu2 %v64_v2  ;;  %171 = vmatpush.msra.mxu3 %v65_v3  ;;  %v63_v8 = vld [vmem:[#allocation5 + $0x8] sm:$0xff]  ;;  %v61_v9 = vld [vmem:[#allocation2 + $0x8] sm:$0xff]  ;;  %v70_v10 = vld [vmem:[#allocation7] sm:$0xf] }
  0x13   :  { %211 = vmatmul.msk.f32.vlgmr.msra.gmra.mxu2 %vm80_vm0, %v60_v4  ;;  %213 = vmatmul.msk.f32.vlgmr.msra.gmra.mxu3 %vm80_vm0, %v60_v4  ;;  %v72_v11 = vperm.slane %v70_v10, 0  ;;  %v73_v12 = vperm.slane %v70_v10, 1  ;;  %v74_v15 = vperm.slane %v70_v10, 2  ;;  %v75_v16 = vperm.slane %v70_v10, 3 }
  0x14   :  { %124 = vmatpush.msra.mxu1 %v67_v6  ;;  %102 = vmatpush.msra.mxu0 %v62_v7 }
  0x15   :  { %207 = vmatmul.msk.f32.vlgmr.msra.gmra.mxu0 %vm80_vm0, %v60_v4 }
  0x16   :  { %125 = vmatpush.msra.mxu1 %v63_v8 }
  0x17   :  { %209 = vmatmul.msk.f32.vlgmr.msra.gmra.mxu1 %vm80_vm0, %v60_v4 }
  0x1b   :  { %212 = vmatmul.msk.f32.gmra.mxu2 %vm80_vm0, %v61_v9  ;;  %214 = vmatmul.msk.f32.gmra.mxu3 %vm80_vm0, %v61_v9 }
  0x1d   :  { %208 = vmatmul.msk.f32.gmra.mxu0 %vm80_vm0, %v61_v9 }
  0x1f   :  { %210 = vmatmul.msk.f32.gmra.mxu1 %vm80_vm0, %v61_v9 }
  0x92   :  { %v104_v13 = vpop.f32.mrf.mxu0 }
  0x93   :  { %v105_v14 = vadd.f32 %v104_v13, %v72_v11 }
  0x94   :  { %v127_v17 = vpop.f32.mrf.mxu1 }
  0x95   :  { %179 = vst [vmem:[#allocation8] sm:$0xff] %v105_v14  ;;  %v128_v18 = vadd.f32 %v127_v17, %v73_v12 }
  0x96   :  { %v150_v19 = vpop.f32.mrf.mxu2  ;;  %v173_v20 = vpop.f32.mrf.mxu3 }
  0x97   :  { %180 = vst [vmem:[#allocation8 + $0x8] sm:$0xff] %v128_v18  ;;  %v151_v21 = vadd.f32 %v150_v19, %v74_v15  ;;  %v174_v22 = vadd.f32 %v173_v20, %v75_v16 }
  0x99   :  { %181 = vst [vmem:[#allocation8 + $0x10] sm:$0xff] %v151_v21 }
  0x9a   :  { %182 = vst [vmem:[#allocation8 + $0x18] sm:$0xff] %v174_v22  ;;  %v107_v23 = vpop.f32.mrf.mxu0 }
  0x9b   :  { %v108_v24 = vadd.f32 %v107_v23, %v72_v11 }
  0x9c   :  { %v130_v25 = vpop.f32.mrf.mxu1 }
  0x9d   :  { %183 = vst [vmem:[#allocation8 + $0x20] sm:$0xff] %v108_v24  ;;  %v131_v26 = vadd.f32 %v130_v25, %v73_v12 }
  0x9e   :  { %v153_v27 = vpop.f32.mrf.mxu2  ;;  %v176_v28 = vpop.f32.mrf.mxu3 }
  0x9f   :  { %184 = vst [vmem:[#allocation8 + $0x28] sm:$0xff] %v131_v26  ;;  %v154_v29 = vadd.f32 %v153_v27, %v74_v15  ;;  %v177_v30 = vadd.f32 %v176_v28, %v75_v16 }
  0xa1   :  { %185 = vst [vmem:[#allocation8 + $0x30] sm:$0xff] %v154_v29 }
  0xa2   :  { %186 = vst [vmem:[#allocation8 + $0x38] sm:$0xff] %v177_v30 }
  0xa3   :  { %199 = dma.vmem_to_hbm [thread:$0]  %s192_s29, 1024, %s194_s5, [#allocation4], %s326_s20, %s326_s20, %s327_s21  }
  0xa4   :  { %323 = dma.done.wait [#allocation4], 1024  }
  0xa5   :  { %324 = vsyncadd [#allocation4], 4294966272 }
  0xa6   :  { %204 = vsyncpa [#allocation3], 1 }
  0xa7   :  { %205 = vsyncpa [#allocation6], 1 }
  0xa8   :  { %206 = vsyncpa [#allocation4], 1 }

</bundles_post_ra>
